<compile_context>
chip_gen: v7x
topology: tpu7x:2x2x1
jax: 0.10.0
libtpu: 0.0.40
codegen_flags: <defaults>
</compile_context>

<pallas_src>
import functools

import jax
import jax.numpy as jnp
from jax import lax
from jax.experimental import pallas as pl
from jax.experimental.pallas import tpu as pltpu

PAD = 128  # lane-dense padded feature width


# --------------------------- fused forward kernel ----------------------------

def _fused_forward_kernel(adj_ref, x_ref, wconv_ref, bconv_ref,
                          w1p_ref, b1_ref, w2_ref, b2_ref, o_ref,
                          *, feat_dims, B, N):
    num_layers = len(feat_dims)
    adj = adj_ref[...]                       # (B*N, B*N) block-diagonal adjacency
    h = x_ref[...]                           # (B*N, PAD), zero-padded columns

    # Accumulator for the first prediction Linear (replaces torch.cat + matmul).
    h1 = jnp.zeros((B, PAD), jnp.float32)

    for i in range(num_layers):              # static unrolled layer loop (depth 3)
        is_last = (i == num_layers - 1)
        d_out = feat_dims[i]
        w = wconv_ref[i]                     # (PAD, PAD), zero outside real block
        b = bconv_ref[i]                     # (1, PAD)

        # GraphConv (add_self=False):  adj @ (h @ W)  ==  (adj @ h) @ W
        # Two flat (B*N, .) matmuls — one MXU pass each, no batched einsum.
        hw = jnp.dot(h, w, preferred_element_type=jnp.float32)          # (BN, PAD)
        y = jnp.dot(adj, hw, preferred_element_type=jnp.float32) + b    # (BN, PAD)

        # F.normalize(y, p=2, dim=2): padded lanes are exactly 0, so the
        # full-lane sum of squares equals the real-feature norm.
        ssq = jnp.sum(y * y, axis=-1, keepdims=True)
        y = y * lax.rsqrt(jnp.maximum(ssq, 1e-24))

        if not is_last:
            # ReLU
            y = jnp.maximum(y, 0.0)
            # apply_bn(): fresh training-mode BatchNorm1d(num_nodes):
            # per-node stats over (batch, real features), gamma=1, beta=0.
            # Masked TWO-PASS variance (subtract-mean form) — no E[y^2]-E[y]^2
            # cancellation; lane mask keeps padded columns out of the sums.
            y3 = y.reshape(B, N, PAD)
            inv_cnt = 1.0 / float(B * d_out)
            mean = jnp.sum(jnp.sum(y3, axis=2, keepdims=True),
                           axis=0, keepdims=True) * inv_cnt             # (1, N, 1)
            lane_mask = lax.broadcasted_iota(jnp.int32, (1, 1, PAD), 2) < d_out
            diff = jnp.where(lane_mask, y3 - mean, 0.0)
            var = jnp.sum(jnp.sum(diff * diff, axis=2, keepdims=True),
                          axis=0, keepdims=True) * inv_cnt
            y3 = (y3 - mean) * lax.rsqrt(var + 1e-5)
            y = y3.reshape(B * N, PAD)
            # (Padded lanes become -mean*rsqrt: harmless — they only ever hit
            #  exactly-zero rows of wconv[i+1] and w1p[i] downstream.)

        # torch.max(x, dim=1) fused with the corresponding slice of the first
        # pred Linear:  h1 += max_nodes(y) @ W1[layer slice]
        m = jnp.max(y.reshape(B, N, PAD), axis=1)                        # (B, PAD)
        h1 = h1 + jnp.dot(m, w1p_ref[i], preferred_element_type=jnp.float32)

        h = y                                                            # carry

    # Prediction MLP: Linear -> ReLU -> Linear. Lane-dense (B, PAD) store;
    # the host slices the label_dim columns (zero-padded weight cols make the
    # extra lanes exactly 0).
    h1 = jnp.maximum(h1 + b1_ref[...], 0.0)
    o_ref[...] = jnp.dot(h1, w2_ref[...], preferred_element_type=jnp.float32) + b2_ref[...]


# ----------------------- one-time parameter preparation -----------------------

def prepare_padded_params(params, num_layers):
    """Pad all weights to lane-dense 128-wide blocks ONCE (cache the result)."""
    hidden = params["conv_first_w"].shape[1]
    embed = params["conv_last_w"].shape[1]
    pred_hidden = params["pred_w1"].shape[1]
    label_dim = params["pred_w2"].shape[1]
    feat_dims = [hidden] * (num_layers - 1) + [embed]

    conv_ws = [params["conv_first_w"]] + list(params["conv_block_w"]) + [params["conv_last_w"]]
    conv_bs = [params["conv_first_b"]] + list(params["conv_block_b"]) + [params["conv_last_b"]]
    wconv = jnp.zeros((num_layers, PAD, PAD), jnp.float32)
    bconv = jnp.zeros((num_layers, 1, PAD), jnp.float32)
    for i in range(num_layers):
        wi, bi = conv_ws[i], conv_bs[i]
        wconv = wconv.at[i, :wi.shape[0], :wi.shape[1]].set(wi)
        bconv = bconv.at[i, 0, :bi.shape[0]].set(bi)

    # Split pred_w1's rows per layer (it consumes the concat of per-layer maxes)
    # and pad each slice so the concat becomes an accumulation in the kernel.
    w1, b1 = params["pred_w1"], params["pred_b1"]
    w1p = jnp.zeros((num_layers, PAD, PAD), jnp.float32)
    off = 0
    for i, d in enumerate(feat_dims):
        w1p = w1p.at[i, :d, :pred_hidden].set(w1[off:off + d, :])
        off += d
    b1p = jnp.zeros((1, PAD), jnp.float32).at[0, :pred_hidden].set(b1)

    w2p = jnp.zeros((PAD, PAD), jnp.float32).at[:pred_hidden, :label_dim].set(params["pred_w2"])
    b2p = jnp.zeros((1, PAD), jnp.float32).at[0, :label_dim].set(params["pred_b2"])

    padded = dict(wconv=wconv, bconv=bconv, w1p=w1p, b1p=b1p, w2p=w2p, b2p=b2p)
    return jax.tree_util.tree_map(jax.block_until_ready, padded), tuple(feat_dims)


# ------------------------------ jitted per-call path --------------------------

@functools.partial(jax.jit, static_argnames=("feat_dims", "label_dim"))
def gcn_encoder_forward(x, adj, padded, *, feat_dims, label_dim):
    B, N, Din = x.shape

    # Zero-pad x to 128 lanes and flatten to (B*N, PAD) inside the jitted
    # program (one dispatch total; no separate per-call pad op).
    x_flat = jnp.zeros((B * N, PAD), jnp.float32).at[:, :Din].set(
        x.reshape(B * N, Din).astype(jnp.float32))

    # Block-diagonal adjacency so the per-batch contraction becomes one flat
    # (B*N, B*N) @ (B*N, PAD) matmul in the kernel.
    adj_bd = jnp.zeros((B * N, B * N), jnp.float32)
    for b in range(B):
        adj_bd = adj_bd.at[b * N:(b + 1) * N, b * N:(b + 1) * N].set(adj[b])

    kernel = functools.partial(_fused_forward_kernel, feat_dims=feat_dims, B=B, N=N)
    vmem = pl.BlockSpec(memory_space=pltpu.MemorySpace.VMEM)
    ypred_pad = pl.pallas_call(
        kernel,
        out_shape=jax.ShapeDtypeStruct((B, PAD), jnp.float32),   # lane-dense store
        in_specs=[vmem] * 8,
        out_specs=vmem,
    )(adj_bd, x_flat, padded["wconv"], padded["bconv"],
      padded["w1p"], padded["b1p"], padded["w2p"], padded["b2p"])
    return ypred_pad[:, :label_dim]


# ------------------------------ pure-JAX reference ----------------------------

def _reference(x, adj, params, num_layers):
    def gconv(h, w, b, relu):
        y = jnp.einsum("bij,bjd->bid", adj, h)
        y = y @ w + b
        n = jnp.sqrt(jnp.sum(y * y, axis=2, keepdims=True))
        y = y / jnp.maximum(n, 1e-12)
        return jnp.maximum(y, 0.0) if relu else y

    def bn(h):
        m = jnp.mean(h, axis=(0, 2), keepdims=True)
        v = jnp.mean((h - m) ** 2, axis=(0, 2), keepdims=True)
        return (h - m) / jnp.sqrt(v + 1e-5)

    h = bn(gconv(x, params["conv_first_w"], params["conv_first_b"], True))
    outs = [jnp.max(h, axis=1)]
    for i in range(num_layers - 2):
        h = bn(gconv(h, params["conv_block_w"][i], params["conv_block_b"][i], True))
        outs.append(jnp.max(h, axis=1))
    h = gconv(h, params["conv_last_w"], params["conv_last_b"], False)
    outs.append(jnp.max(h, axis=1))
    o = jnp.concatenate(outs, axis=1)
    hid = jnp.maximum(o @ params["pred_w1"] + params["pred_b1"], 0.0)
    return hid @ params["pred_w2"] + params["pred_b2"]


# ------------------------------- param init -----------------------------------

def _xavier_uniform(key, fan_in, fan_out, gain):
    bound = gain * (6.0 / (fan_in + fan_out)) ** 0.5
    return jax.random.uniform(key, (fan_in, fan_out), jnp.float32, -bound, bound)


def _linear_init(key, fan_in, fan_out):
    kw, kb = jax.random.split(key)
    bound = 1.0 / (fan_in ** 0.5)
    w = jax.random.uniform(kw, (fan_in, fan_out), jnp.float32, -bound, bound)
    b = jax.random.uniform(kb, (fan_out,), jnp.float32, -bound, bound)
    return w, b


def make_params(key, input_dim, hidden_dim, embedding_dim, label_dim,
                num_layers, pred_hidden_dim):
    gain = 2.0 ** 0.5  # calculate_gain('relu')
    keys = jax.random.split(key, num_layers + 2)
    params = {
        "conv_first_w": _xavier_uniform(keys[0], input_dim, hidden_dim, gain),
        "conv_first_b": jnp.zeros((hidden_dim,), jnp.float32),
        "conv_block_w": [_xavier_uniform(keys[1 + i], hidden_dim, hidden_dim, gain)
                         for i in range(num_layers - 2)],
        "conv_block_b": [jnp.zeros((hidden_dim,), jnp.float32)
                         for _ in range(num_layers - 2)],
        "conv_last_w": _xavier_uniform(keys[num_layers - 1], hidden_dim, embedding_dim, gain),
        "conv_last_b": jnp.zeros((embedding_dim,), jnp.float32),
    }
    pred_input_dim = hidden_dim * (num_layers - 1) + embedding_dim  # concat=True, num_aggs=1
    w1, b1 = _linear_init(keys[num_layers], pred_input_dim, pred_hidden_dim)
    w2, b2 = _linear_init(keys[num_layers + 1], pred_hidden_dim, label_dim)
    params.update({"pred_w1": w1, "pred_b1": b1, "pred_w2": w2, "pred_b2": b2})
    return params


if __name__ == "__main__":
    B, N = 2, 16
    input_dim, hidden_dim, embedding_dim, label_dim = 8, 32, 16, 4
    num_layers = 3
    pred_hidden_dim = 50

    key = jax.random.PRNGKey(0)
    kx, ka, kp = jax.random.split(key, 3)

    x = jax.random.normal(kx, (B, N, input_dim), jnp.float32)
    a = jax.random.uniform(ka, (B, N, N), jnp.float32)
    adj = ((a + jnp.transpose(a, (0, 2, 1))) > 1.0).astype(jnp.float32)
    adj = adj + jnp.eye(N, dtype=jnp.float32)[None, :, :]   # self loops in adjacency

    params = make_params(kp, input_dim, hidden_dim, embedding_dim, label_dim,
                         num_layers, pred_hidden_dim)

    # One-time padded-parameter preparation (cached across forwards).
    padded, feat_dims = prepare_padded_params(params, num_layers)

    ypred = gcn_encoder_forward(x, adj, padded, feat_dims=feat_dims,
                                label_dim=label_dim)
    ypred = jax.block_until_ready(ypred)

    ref = jax.block_until_ready(_reference(x, adj, params, num_layers))
    assert ypred.shape == (B, label_dim)
    assert jnp.allclose(ypred, ref, rtol=1e-3, atol=1e-3), "mismatch vs pure-JAX reference"

    print("KERNEL_OK")
</pallas_src>

<mosaic_0001>
module attributes {stable_mosaic.version = 11 : i64} {
  func.func @_fused_forward_kernel(%arg0: memref<32x32xf32, #tpu.memory_space<vmem>>, %arg1: memref<32x128xf32, #tpu.memory_space<vmem>>, %arg2: memref<3x128x128xf32, #tpu.memory_space<vmem>>, %arg3: memref<3x1x128xf32, #tpu.memory_space<vmem>>, %arg4: memref<3x128x128xf32, #tpu.memory_space<vmem>>, %arg5: memref<1x128xf32, #tpu.memory_space<vmem>>, %arg6: memref<128x128xf32, #tpu.memory_space<vmem>>, %arg7: memref<1x128xf32, #tpu.memory_space<vmem>>, %arg8: memref<2x128xf32, #tpu.memory_space<vmem>>) attributes {dimension_semantics = [], scalar_prefetch = 0 : i64, scratch_operands = 0 : i64, tpu.core_type = #tpu.core_type<tc>} {
    %c0 = arith.constant 0 : index
    %c0_0 = arith.constant 0 : index
    %0 = vector.load %arg0[%c0, %c0_0] : memref<32x32xf32, #tpu.memory_space<vmem>>, vector<32x32xf32>
    %c0_1 = arith.constant 0 : index
    %c0_2 = arith.constant 0 : index
    %1 = vector.load %arg1[%c0_1, %c0_2] : memref<32x128xf32, #tpu.memory_space<vmem>>, vector<32x128xf32>
    %cst = arith.constant 0.000000e+00 : f32
    %2 = vector.broadcast %cst : f32 to vector<2x128xf32>
    %c0_3 = arith.constant 0 : index
    %c0_4 = arith.constant 0 : index
    %c0_5 = arith.constant 0 : index
    %3 = vector.load %arg2[%c0_3, %c0_4, %c0_5] : memref<3x128x128xf32, #tpu.memory_space<vmem>>, vector<1x128x128xf32>
    %4 = vector.shape_cast %3 : vector<1x128x128xf32> to vector<128x128xf32>
    %c0_6 = arith.constant 0 : index
    %c0_7 = arith.constant 0 : index
    %c0_8 = arith.constant 0 : index
    %5 = vector.load %arg3[%c0_6, %c0_7, %c0_8] : memref<3x1x128xf32, #tpu.memory_space<vmem>>, vector<1x1x128xf32>
    %6 = vector.shape_cast %5 : vector<1x1x128xf32> to vector<1x128xf32>
    %cst_9 = arith.constant dense<0.000000e+00> : vector<32x128xf32>
    %7 = tpu.matmul %1, %4, %cst_9 {dimension_numbers = #tpu.dot_dimension_numbers<[1], [0], [0], [1], [0, 0, 1, 1], [], []>} : vector<32x128xf32>, vector<128x128xf32>, vector<32x128xf32> -> vector<32x128xf32>
    %cst_10 = arith.constant dense<0.000000e+00> : vector<32x128xf32>
    %8 = tpu.matmul %0, %7, %cst_10 {dimension_numbers = #tpu.dot_dimension_numbers<[1], [0], [0], [1], [0, 0, 1, 1], [], []>} : vector<32x32xf32>, vector<32x128xf32>, vector<32x128xf32> -> vector<32x128xf32>
    %9 = vector.broadcast %6 : vector<1x128xf32> to vector<32x128xf32>
    %10 = arith.addf %8, %9 : vector<32x128xf32>
    %11 = arith.mulf %10, %10 : vector<32x128xf32>
    %cst_11 = arith.constant dense<0.000000e+00> : vector<32xf32>
    %12 = vector.multi_reduction <add>, %11, %cst_11 [1] : vector<32x128xf32> to vector<32xf32>
    %13 = vector.shape_cast %12 : vector<32xf32> to vector<32x1xf32>
    %cst_12 = arith.constant 1.000000e-24 : f32
    %14 = vector.broadcast %cst_12 : f32 to vector<32x1xf32>
    %15 = arith.maximumf %13, %14 : vector<32x1xf32>
    %16 = math.rsqrt %15 : vector<32x1xf32>
    %17 = vector.broadcast %16 : vector<32x1xf32> to vector<32x128xf32>
    %18 = arith.mulf %10, %17 : vector<32x128xf32>
    %cst_13 = arith.constant 0.000000e+00 : f32
    %19 = vector.broadcast %cst_13 : f32 to vector<32x128xf32>
    %20 = arith.maximumf %18, %19 : vector<32x128xf32>
    %21 = vector.shape_cast %20 : vector<32x128xf32> to vector<2x16x128xf32>
    %cst_14 = arith.constant dense<0.000000e+00> : vector<2x16xf32>
    %22 = vector.multi_reduction <add>, %21, %cst_14 [2] : vector<2x16x128xf32> to vector<2x16xf32>
    %23 = vector.shape_cast %22 : vector<2x16xf32> to vector<2x16x1xf32>
    %cst_15 = arith.constant dense<0.000000e+00> : vector<16x1xf32>
    %24 = vector.multi_reduction <add>, %23, %cst_15 [0] : vector<2x16x1xf32> to vector<16x1xf32>
    %25 = vector.shape_cast %24 : vector<16x1xf32> to vector<1x16x1xf32>
    %cst_16 = arith.constant 1.562500e-02 : f32
    %26 = vector.broadcast %cst_16 : f32 to vector<1x16x1xf32>
    %27 = arith.mulf %25, %26 : vector<1x16x1xf32>
    %28 = tpu.iota {dimensions = array<i32: 2>} : vector<1x1x128xi32>
    %c32_i32 = arith.constant 32 : i32
    %29 = vector.broadcast %c32_i32 : i32 to vector<1x1x128xi32>
    %30 = arith.cmpi slt, %28, %29 : vector<1x1x128xi32>
    %31 = vector.broadcast %27 : vector<1x16x1xf32> to vector<2x16x128xf32>
    %32 = arith.subf %21, %31 : vector<2x16x128xf32>
    %cst_17 = arith.constant 0.000000e+00 : f32
    %33 = vector.shape_cast %30 : vector<1x1x128xi1> to vector<1x1x128xi1>
    %34 = vector.broadcast %33 : vector<1x1x128xi1> to vector<2x16x128xi1>
    %35 = vector.broadcast %cst_17 : f32 to vector<2x16x128xf32>
    %36 = arith.select %34, %32, %35 : vector<2x16x128xi1>, vector<2x16x128xf32>
    %37 = arith.mulf %36, %36 : vector<2x16x128xf32>
    %cst_18 = arith.constant dense<0.000000e+00> : vector<2x16xf32>
    %38 = vector.multi_reduction <add>, %37, %cst_18 [2] : vector<2x16x128xf32> to vector<2x16xf32>
    %39 = vector.shape_cast %38 : vector<2x16xf32> to vector<2x16x1xf32>
    %cst_19 = arith.constant dense<0.000000e+00> : vector<16x1xf32>
    %40 = vector.multi_reduction <add>, %39, %cst_19 [0] : vector<2x16x1xf32> to vector<16x1xf32>
    %41 = vector.shape_cast %40 : vector<16x1xf32> to vector<1x16x1xf32>
    %cst_20 = arith.constant 1.562500e-02 : f32
    %42 = vector.broadcast %cst_20 : f32 to vector<1x16x1xf32>
    %43 = arith.mulf %41, %42 : vector<1x16x1xf32>
    %44 = vector.broadcast %27 : vector<1x16x1xf32> to vector<2x16x128xf32>
    %45 = arith.subf %21, %44 : vector<2x16x128xf32>
    %cst_21 = arith.constant 9.99999974E-6 : f32
    %46 = vector.broadcast %cst_21 : f32 to vector<1x16x1xf32>
    %47 = arith.addf %43, %46 : vector<1x16x1xf32>
    %48 = math.rsqrt %47 : vector<1x16x1xf32>
    %49 = vector.broadcast %48 : vector<1x16x1xf32> to vector<2x16x128xf32>
    %50 = arith.mulf %45, %49 : vector<2x16x128xf32>
    %51 = vector.shape_cast %50 : vector<2x16x128xf32> to vector<32x128xf32>
    %52 = vector.shape_cast %51 : vector<32x128xf32> to vector<2x16x128xf32>
    %cst_22 = arith.constant dense<0xFF800000> : vector<2x128xf32>
    %53 = vector.multi_reduction <maximumf>, %52, %cst_22 [1] : vector<2x16x128xf32> to vector<2x128xf32>
    %c0_23 = arith.constant 0 : index
    %c0_24 = arith.constant 0 : index
    %c0_25 = arith.constant 0 : index
    %54 = vector.load %arg4[%c0_23, %c0_24, %c0_25] : memref<3x128x128xf32, #tpu.memory_space<vmem>>, vector<1x128x128xf32>
    %55 = vector.shape_cast %54 : vector<1x128x128xf32> to vector<128x128xf32>
    %cst_26 = arith.constant dense<0.000000e+00> : vector<2x128xf32>
    %56 = tpu.matmul %53, %55, %cst_26 {dimension_numbers = #tpu.dot_dimension_numbers<[1], [0], [0], [1], [0, 0, 1, 1], [], []>} : vector<2x128xf32>, vector<128x128xf32>, vector<2x128xf32> -> vector<2x128xf32>
    %57 = arith.addf %2, %56 : vector<2x128xf32>
    %c1 = arith.constant 1 : index
    %c0_27 = arith.constant 0 : index
    %c0_28 = arith.constant 0 : index
    %58 = vector.load %arg2[%c1, %c0_27, %c0_28] : memref<3x128x128xf32, #tpu.memory_space<vmem>>, vector<1x128x128xf32>
    %59 = vector.shape_cast %58 : vector<1x128x128xf32> to vector<128x128xf32>
    %c1_29 = arith.constant 1 : index
    %c0_30 = arith.constant 0 : index
    %c0_31 = arith.constant 0 : index
    %60 = vector.load %arg3[%c1_29, %c0_30, %c0_31] : memref<3x1x128xf32, #tpu.memory_space<vmem>>, vector<1x1x128xf32>
    %61 = vector.shape_cast %60 : vector<1x1x128xf32> to vector<1x128xf32>
    %cst_32 = arith.constant dense<0.000000e+00> : vector<32x128xf32>
    %62 = tpu.matmul %51, %59, %cst_32 {dimension_numbers = #tpu.dot_dimension_numbers<[1], [0], [0], [1], [0, 0, 1, 1], [], []>} : vector<32x128xf32>, vector<128x128xf32>, vector<32x128xf32> -> vector<32x128xf32>
    %cst_33 = arith.constant dense<0.000000e+00> : vector<32x128xf32>
    %63 = tpu.matmul %0, %62, %cst_33 {dimension_numbers = #tpu.dot_dimension_numbers<[1], [0], [0], [1], [0, 0, 1, 1], [], []>} : vector<32x32xf32>, vector<32x128xf32>, vector<32x128xf32> -> vector<32x128xf32>
    %64 = vector.broadcast %61 : vector<1x128xf32> to vector<32x128xf32>
    %65 = arith.addf %63, %64 : vector<32x128xf32>
    %66 = arith.mulf %65, %65 : vector<32x128xf32>
    %cst_34 = arith.constant dense<0.000000e+00> : vector<32xf32>
    %67 = vector.multi_reduction <add>, %66, %cst_34 [1] : vector<32x128xf32> to vector<32xf32>
    %68 = vector.shape_cast %67 : vector<32xf32> to vector<32x1xf32>
    %cst_35 = arith.constant 1.000000e-24 : f32
    %69 = vector.broadcast %cst_35 : f32 to vector<32x1xf32>
    %70 = arith.maximumf %68, %69 : vector<32x1xf32>
    %71 = math.rsqrt %70 : vector<32x1xf32>
    %72 = vector.broadcast %71 : vector<32x1xf32> to vector<32x128xf32>
    %73 = arith.mulf %65, %72 : vector<32x128xf32>
    %cst_36 = arith.constant 0.000000e+00 : f32
    %74 = vector.broadcast %cst_36 : f32 to vector<32x128xf32>
    %75 = arith.maximumf %73, %74 : vector<32x128xf32>
    %76 = vector.shape_cast %75 : vector<32x128xf32> to vector<2x16x128xf32>
    %cst_37 = arith.constant dense<0.000000e+00> : vector<2x16xf32>
    %77 = vector.multi_reduction <add>, %76, %cst_37 [2] : vector<2x16x128xf32> to vector<2x16xf32>
    %78 = vector.shape_cast %77 : vector<2x16xf32> to vector<2x16x1xf32>
    %cst_38 = arith.constant dense<0.000000e+00> : vector<16x1xf32>
    %79 = vector.multi_reduction <add>, %78, %cst_38 [0] : vector<2x16x1xf32> to vector<16x1xf32>
    %80 = vector.shape_cast %79 : vector<16x1xf32> to vector<1x16x1xf32>
    %cst_39 = arith.constant 1.562500e-02 : f32
    %81 = vector.broadcast %cst_39 : f32 to vector<1x16x1xf32>
    %82 = arith.mulf %80, %81 : vector<1x16x1xf32>
    %83 = tpu.iota {dimensions = array<i32: 2>} : vector<1x1x128xi32>
    %c32_i32_40 = arith.constant 32 : i32
    %84 = vector.broadcast %c32_i32_40 : i32 to vector<1x1x128xi32>
    %85 = arith.cmpi slt, %83, %84 : vector<1x1x128xi32>
    %86 = vector.broadcast %82 : vector<1x16x1xf32> to vector<2x16x128xf32>
    %87 = arith.subf %76, %86 : vector<2x16x128xf32>
    %cst_41 = arith.constant 0.000000e+00 : f32
    %88 = vector.shape_cast %85 : vector<1x1x128xi1> to vector<1x1x128xi1>
    %89 = vector.broadcast %88 : vector<1x1x128xi1> to vector<2x16x128xi1>
    %90 = vector.broadcast %cst_41 : f32 to vector<2x16x128xf32>
    %91 = arith.select %89, %87, %90 : vector<2x16x128xi1>, vector<2x16x128xf32>
    %92 = arith.mulf %91, %91 : vector<2x16x128xf32>
    %cst_42 = arith.constant dense<0.000000e+00> : vector<2x16xf32>
    %93 = vector.multi_reduction <add>, %92, %cst_42 [2] : vector<2x16x128xf32> to vector<2x16xf32>
    %94 = vector.shape_cast %93 : vector<2x16xf32> to vector<2x16x1xf32>
    %cst_43 = arith.constant dense<0.000000e+00> : vector<16x1xf32>
    %95 = vector.multi_reduction <add>, %94, %cst_43 [0] : vector<2x16x1xf32> to vector<16x1xf32>
    %96 = vector.shape_cast %95 : vector<16x1xf32> to vector<1x16x1xf32>
    %cst_44 = arith.constant 1.562500e-02 : f32
    %97 = vector.broadcast %cst_44 : f32 to vector<1x16x1xf32>
    %98 = arith.mulf %96, %97 : vector<1x16x1xf32>
    %99 = vector.broadcast %82 : vector<1x16x1xf32> to vector<2x16x128xf32>
    %100 = arith.subf %76, %99 : vector<2x16x128xf32>
    %cst_45 = arith.constant 9.99999974E-6 : f32
    %101 = vector.broadcast %cst_45 : f32 to vector<1x16x1xf32>
    %102 = arith.addf %98, %101 : vector<1x16x1xf32>
    %103 = math.rsqrt %102 : vector<1x16x1xf32>
    %104 = vector.broadcast %103 : vector<1x16x1xf32> to vector<2x16x128xf32>
    %105 = arith.mulf %100, %104 : vector<2x16x128xf32>
    %106 = vector.shape_cast %105 : vector<2x16x128xf32> to vector<32x128xf32>
    %107 = vector.shape_cast %106 : vector<32x128xf32> to vector<2x16x128xf32>
    %cst_46 = arith.constant dense<0xFF800000> : vector<2x128xf32>
    %108 = vector.multi_reduction <maximumf>, %107, %cst_46 [1] : vector<2x16x128xf32> to vector<2x128xf32>
    %c1_47 = arith.constant 1 : index
    %c0_48 = arith.constant 0 : index
    %c0_49 = arith.constant 0 : index
    %109 = vector.load %arg4[%c1_47, %c0_48, %c0_49] : memref<3x128x128xf32, #tpu.memory_space<vmem>>, vector<1x128x128xf32>
    %110 = vector.shape_cast %109 : vector<1x128x128xf32> to vector<128x128xf32>
    %cst_50 = arith.constant dense<0.000000e+00> : vector<2x128xf32>
    %111 = tpu.matmul %108, %110, %cst_50 {dimension_numbers = #tpu.dot_dimension_numbers<[1], [0], [0], [1], [0, 0, 1, 1], [], []>} : vector<2x128xf32>, vector<128x128xf32>, vector<2x128xf32> -> vector<2x128xf32>
    %112 = arith.addf %57, %111 : vector<2x128xf32>
    %c2 = arith.constant 2 : index
    %c0_51 = arith.constant 0 : index
    %c0_52 = arith.constant 0 : index
    %113 = vector.load %arg2[%c2, %c0_51, %c0_52] : memref<3x128x128xf32, #tpu.memory_space<vmem>>, vector<1x128x128xf32>
    %114 = vector.shape_cast %113 : vector<1x128x128xf32> to vector<128x128xf32>
    %c2_53 = arith.constant 2 : index
    %c0_54 = arith.constant 0 : index
    %c0_55 = arith.constant 0 : index
    %115 = vector.load %arg3[%c2_53, %c0_54, %c0_55] : memref<3x1x128xf32, #tpu.memory_space<vmem>>, vector<1x1x128xf32>
    %116 = vector.shape_cast %115 : vector<1x1x128xf32> to vector<1x128xf32>
    %cst_56 = arith.constant dense<0.000000e+00> : vector<32x128xf32>
    %117 = tpu.matmul %106, %114, %cst_56 {dimension_numbers = #tpu.dot_dimension_numbers<[1], [0], [0], [1], [0, 0, 1, 1], [], []>} : vector<32x128xf32>, vector<128x128xf32>, vector<32x128xf32> -> vector<32x128xf32>
    %cst_57 = arith.constant dense<0.000000e+00> : vector<32x128xf32>
    %118 = tpu.matmul %0, %117, %cst_57 {dimension_numbers = #tpu.dot_dimension_numbers<[1], [0], [0], [1], [0, 0, 1, 1], [], []>} : vector<32x32xf32>, vector<32x128xf32>, vector<32x128xf32> -> vector<32x128xf32>
    %119 = vector.broadcast %116 : vector<1x128xf32> to vector<32x128xf32>
    %120 = arith.addf %118, %119 : vector<32x128xf32>
    %121 = arith.mulf %120, %120 : vector<32x128xf32>
    %cst_58 = arith.constant dense<0.000000e+00> : vector<32xf32>
    %122 = vector.multi_reduction <add>, %121, %cst_58 [1] : vector<32x128xf32> to vector<32xf32>
    %123 = vector.shape_cast %122 : vector<32xf32> to vector<32x1xf32>
    %cst_59 = arith.constant 1.000000e-24 : f32
    %124 = vector.broadcast %cst_59 : f32 to vector<32x1xf32>
    %125 = arith.maximumf %123, %124 : vector<32x1xf32>
    %126 = math.rsqrt %125 : vector<32x1xf32>
    %127 = vector.broadcast %126 : vector<32x1xf32> to vector<32x128xf32>
    %128 = arith.mulf %120, %127 : vector<32x128xf32>
    %129 = vector.shape_cast %128 : vector<32x128xf32> to vector<2x16x128xf32>
    %cst_60 = arith.constant dense<0xFF800000> : vector<2x128xf32>
    %130 = vector.multi_reduction <maximumf>, %129, %cst_60 [1] : vector<2x16x128xf32> to vector<2x128xf32>
    %c2_61 = arith.constant 2 : index
    %c0_62 = arith.constant 0 : index
    %c0_63 = arith.constant 0 : index
    %131 = vector.load %arg4[%c2_61, %c0_62, %c0_63] : memref<3x128x128xf32, #tpu.memory_space<vmem>>, vector<1x128x128xf32>
    %132 = vector.shape_cast %131 : vector<1x128x128xf32> to vector<128x128xf32>
    %cst_64 = arith.constant dense<0.000000e+00> : vector<2x128xf32>
    %133 = tpu.matmul %130, %132, %cst_64 {dimension_numbers = #tpu.dot_dimension_numbers<[1], [0], [0], [1], [0, 0, 1, 1], [], []>} : vector<2x128xf32>, vector<128x128xf32>, vector<2x128xf32> -> vector<2x128xf32>
    %134 = arith.addf %112, %133 : vector<2x128xf32>
    %c0_65 = arith.constant 0 : index
    %c0_66 = arith.constant 0 : index
    %135 = vector.load %arg5[%c0_65, %c0_66] : memref<1x128xf32, #tpu.memory_space<vmem>>, vector<1x128xf32>
    %136 = vector.broadcast %135 : vector<1x128xf32> to vector<2x128xf32>
    %137 = arith.addf %134, %136 : vector<2x128xf32>
    %cst_67 = arith.constant 0.000000e+00 : f32
    %138 = vector.broadcast %cst_67 : f32 to vector<2x128xf32>
    %139 = arith.maximumf %137, %138 : vector<2x128xf32>
    %c0_68 = arith.constant 0 : index
    %c0_69 = arith.constant 0 : index
    %140 = vector.load %arg6[%c0_68, %c0_69] : memref<128x128xf32, #tpu.memory_space<vmem>>, vector<128x128xf32>
    %cst_70 = arith.constant dense<0.000000e+00> : vector<2x128xf32>
    %141 = tpu.matmul %139, %140, %cst_70 {dimension_numbers = #tpu.dot_dimension_numbers<[1], [0], [0], [1], [0, 0, 1, 1], [], []>} : vector<2x128xf32>, vector<128x128xf32>, vector<2x128xf32> -> vector<2x128xf32>
    %c0_71 = arith.constant 0 : index
    %c0_72 = arith.constant 0 : index
    %142 = vector.load %arg7[%c0_71, %c0_72] : memref<1x128xf32, #tpu.memory_space<vmem>>, vector<1x128xf32>
    %143 = vector.broadcast %142 : vector<1x128xf32> to vector<2x128xf32>
    %144 = arith.addf %141, %143 : vector<2x128xf32>
    %c0_73 = arith.constant 0 : index
    %c0_74 = arith.constant 0 : index
    %145 = vector.load %arg8[%c0_73, %c0_74] : memref<2x128xf32, #tpu.memory_space<vmem>>, vector<2x128xf32>
    tpu.vector_store %arg8[%c0_73, %c0_74], %144 {strides = array<i32>} : memref<2x128xf32, #tpu.memory_space<vmem>>, vector<2x128xf32>,
    return
  }
}

</mosaic_0001>

<bundles_post_ra>
// kernel: gcn_encoder_forward.1
= control target key start
LH: loop header
LB: loop body
LE: loop exit
PB: predicated region body
PF: predicated region fallthrough
CT: control target
= control target key end

     0   :  { %13 = vsyncpa [#allocation3], 0  ;;  %s2377_s0 = inlined_call_operand.vmem [shape: f32[32,32], index: 0, kind: input, shape index: {}]   ;;  %s2378_s1 = inlined_call_operand.vmem [shape: f32[32,128], index: 1, kind: input, shape index: {}]   ;;  %s2379_s2 = inlined_call_operand.hbm [shape: f32[3,128,128], index: 2, kind: input, shape index: {}]   ;;  %s2380_s3 = inlined_call_operand.vmem [shape: f32[3,1,128], index: 3, kind: input, shape index: {}]   ;;  %s2381_s4 = inlined_call_operand.hbm [shape: f32[3,128,128], index: 4, kind: input, shape index: {}]   ;;  %s2382_s5 = inlined_call_operand.vmem [shape: f32[1,128], index: 5, kind: input, shape index: {}]   ;;  %s2383_s6 = inlined_call_operand.vmem [shape: f32[128,128], index: 6, kind: input, shape index: {}]   ;;  %s2384_s7 = inlined_call_operand.vmem [shape: f32[1,128], index: 7, kind: input, shape index: {}]   ;;  %s2385_s8 = inlined_call_operand.hbm [shape: f32[2,128], index: 8, kind: output, shape index: {}]  }
   0x1   :  { %14 = vsyncpa [#allocation6], 0 }
   0x2   :  { %15 = vsyncpa [#allocation4], 0  ;;  %s2065_s27 = smov [#allocation2]   ;;  %s1993_s9 = scalar_lea.hbm %s2379_s2, 6144 }
   0x3   :  { %s25_s28 = sshll.u32 %s2065_s27, 4  ;;  %p1994_p0 = scmp.ne.s32.totalorder %s2379_s2, %s1993_s9  ;;  %s26_s28 = int_to_ptr.vmem [resolvable:$true] %s25_s28 }
   0x4   :  { %p1997_p1 = scmp.lt.u32.totalorder %s1993_s9, %s2379_s2 }
   0x6   :  { %p1999_p2 = pnand %p1997_p1, %p1994_p0 }
   0x8   :  { %2002 = shalt.err (!%p1999_p2)
}
   0x9   :  { %s2003_s14 = scalar_lea.vmem %s26_s28, 6144  ;;  %p2008_p4 = scmp.lt.s32.totalorder %s26_s28, %s26_s28 }
   0xa   :  { %p2004_p3 = scmp.ne.s32.totalorder %s26_s28, %s2003_s14  ;;  %p2009_p5 = scmp.lt.s32.totalorder %s2003_s14, %s2003_s14 }
   0xc   :  { %p2010_p6 = por %p2009_p5, %p2008_p4 }
   0xe   :  { %p2011_p7 = pnand %p2010_p6, %p2004_p3 }
  0x10   :  { %2014 = shalt.err (!%p2011_p7)
}
  0x11   :  { %s2066_s15 = smov 128   ;;  %s2067_s16 = smov 8  }
  0x12   :  { %31 = dma.hbm_to_vmem [thread:$0]  %s2379_s2, 6144, %s26_s28, [#allocation3], %s2066_s15, %s2066_s15, %s2067_s16  }
  0x13   :  { %s2068_s19 = smov [#allocation5]   ;;  %s2015_s23 = scalar_lea.hbm %s2381_s4, 6144 }
  0x14   :  { %s39_s20 = sshll.u32 %s2068_s19, 4  ;;  %p2016_p8 = scmp.ne.s32.totalorder %s2381_s4, %s2015_s23  ;;  %s40_s20 = int_to_ptr.vmem [resolvable:$true] %s39_s20 }
  0x15   :  { %p2019_p9 = scmp.lt.u32.totalorder %s2015_s23, %s2381_s4 }
  0x17   :  { %p2021_p10 = pnand %p2019_p9, %p2016_p8 }
  0x19   :  { %2024 = shalt.err (!%p2021_p10)
}
  0x1a   :  { %s2025_s29 = scalar_lea.vmem %s40_s20, 6144  ;;  %p2030_p12 = scmp.lt.s32.totalorder %s40_s20, %s40_s20 }
  0x1b   :  { %p2026_p11 = scmp.ne.s32.totalorder %s40_s20, %s2025_s29  ;;  %p2031_p13 = scmp.lt.s32.totalorder %s2025_s29, %s2025_s29 }
  0x1d   :  { %p2032_p0 = por %p2031_p13, %p2030_p12 }
  0x1f   :  { %p2033_p1 = pnand %p2032_p0, %p2026_p11 }
  0x21   :  { %2036 = shalt.err (!%p2033_p1)
}
  0x22   :  { %45 = dma.hbm_to_vmem [thread:$0]  %s2381_s4, 6144, %s40_s20, [#allocation6], %s2066_s15, %s2066_s15, %s2067_s16  }
  0x23   :  { %2059 = dma.done.wait [#allocation3], 6144  }
  0x24   :  { %2060 = vsyncadd [#allocation3], 4294961152 }
  0x25   :  { %2061 = dma.done.wait [#allocation6], 6144  }
  0x26   :  { %2062 = vsyncadd [#allocation6], 4294961152  ;;  %v66_v0 = vld [vmem:[#allocation2] sm:$0xff]  ;;  %v67_v1 = vld [vmem:[#allocation2 + $0x8] sm:$0xff]  ;;  %vm174_vm0 = vcmask 261120   ;;  %vm679_vm2 = vcmask 1041409  }
  0x27   :  { %v68_v2 = vld [vmem:[#allocation2 + $0x10] sm:$0xff]  ;;  %v1737_v3 = vpack.c.bf16 %v67_v1, %v66_v0  ;;  %v69_v4 = vld [vmem:[#allocation2 + $0x18] sm:$0xff]  ;;  %v70_v6 = vld [vmem:[#allocation2 + $0x20] sm:$0xff]  ;;  %vm2070_vm3 = vmmov 0   ;;  %s2072_s11 = smov [#allocation7]  }
  0x28   :  { %v1741_v5 = vpack.c.bf16 %v69_v4, %v68_v2  ;;  %v71_v7 = vld [vmem:[#allocation2 + $0x28] sm:$0xff]  ;;  %v62_v9 = vld [vmem:[%s2378_s1] sm:$0xff]  ;;  %v72_v10 = vld [vmem:[#allocation2 + $0x30] sm:$0xff]  ;;  %s1260_s12 = sshll.u32 %s2072_s11, 4  ;;  %s1261_s12 = int_to_ptr.vmem [resolvable:$true] %s1260_s12 }
  0x29   :  { %1738 = vmatprep.subr.bf16.mxu0 %v1737_v3  ;;  %v1745_v8 = vpack.c.bf16 %v71_v7, %v70_v6  ;;  %v73_v11 = vld [vmem:[#allocation2 + $0x38] sm:$0xff]  ;;  %1473 = vmatprep.mubr.f32.mxu0 %v62_v9  ;;  %v74_v13 = vld [vmem:[#allocation2 + $0x40] sm:$0xff]  ;;  %v75_v14 = vld [vmem:[#allocation2 + $0x48] sm:$0xff]  ;;  %p2042_p3 = scmp.lt.s32.totalorder %s1261_s12, %s1261_s12 }
  0x2a   :  { %1740 = vmatpush3.bf16.msra.mxu0 %v1737_v3  ;;  %v1749_v12 = vpack.c.bf16 %v73_v11, %v72_v10  ;;  %v1753_v15 = vpack.c.bf16 %v75_v14, %v74_v13  ;;  %v76_v16 = vld [vmem:[#allocation2 + $0x50] sm:$0xff]  ;;  %v77_v17 = vld [vmem:[#allocation2 + $0x58] sm:$0xff]  ;;  %v78_v19 = vld [vmem:[#allocation2 + $0x60] sm:$0xff] }
  0x2b   :  { %1742 = vmatprep.subr.bf16.mxu0 %v1741_v5  ;;  %v1757_v18 = vpack.c.bf16 %v77_v17, %v76_v16  ;;  %v79_v20 = vld [vmem:[#allocation2 + $0x68] sm:$0xff]  ;;  %v80_v22 = vld [vmem:[#allocation2 + $0x70] sm:$0xff]  ;;  %v81_v23 = vld [vmem:[#allocation2 + $0x78] sm:$0xff]  ;;  %v312_v16 = vlaneseq }
  0x2c   :  { %v1761_v21 = vpack.c.bf16 %v79_v20, %v78_v19  ;;  %v1765_v24 = vpack.c.bf16 %v81_v23, %v80_v22  ;;  %v63_v25 = vld [vmem:[%s2378_s1 + $0x8] sm:$0xff]  ;;  %v64_v26 = vld [vmem:[%s2378_s1 + $0x10] sm:$0xff]  ;;  %v65_v27 = vld [vmem:[%s2378_s1 + $0x18] sm:$0xff] }
  0x2d   :  { %v2157_v28 = vld [vmem:[%s2377_s0] sm:$0xff]  ;;  %v2164_v35 = vld [vmem:[%s2377_s0 + $0x8] sm:$0xff]  ;;  %v2169_v36 = vld [vmem:[%s2377_s0 + $0x10] sm:$0xff]  ;;  %v2185_v19 = vand.u32 127, %v312_v16 }
  0x2e   :  { %1744 = vmatpush3.bf16.msra.mxu0 %v1741_v5  ;;  %1487 = vmatprep.mubr.msk.f32.mxu1 %vm174_vm0, %v2157_v28  ;;  %v2178_v37 = vld [vmem:[%s2377_s0 + $0x18] sm:$0xff]  ;;  %v1270_v38 = vld [vmem:[%s2380_s3] ss:$0 sm:$0xff]  ;;  %v382_v9 = vld [vmem:[#allocation2 + $0x90] sm:$0xff] }
  0x2f   :  { %1746 = vmatprep.subr.bf16.mxu0 %v1745_v8  ;;  %v380_v7 = vld [vmem:[#allocation2 + $0x80] sm:$0xff]  ;;  %v383_v11 = vld [vmem:[#allocation2 + $0x98] sm:$0xff]  ;;  %v385_v14 = vld [vmem:[#allocation2 + $0xa8] sm:$0xff]  ;;  %vm314_vm1 = vcmp.lt.s32.totalorder %v2185_v19, 32 }
  0x30   :  { %v384_v13 = vld [vmem:[#allocation2 + $0xa0] sm:$0xff]  ;;  %v666_v19 = vld [vmem:[#allocation5 + $0xa8] sm:$0xff] }
  0x32   :  { %1748 = vmatpush3.bf16.msra.mxu0 %v1745_v8  ;;  %v381_v8 = vld [vmem:[#allocation2 + $0x88] sm:$0xff] }
  0x33   :  { %1750 = vmatprep.subr.bf16.mxu0 %v1749_v12  ;;  %v1777_v10 = vpack.c.bf16 %v381_v8, %v380_v7 }
  0x36   :  { %1752 = vmatpush3.bf16.msra.mxu0 %v1749_v12  ;;  %v1781_v12 = vpack.c.bf16 %v383_v11, %v382_v9 }
  0x37   :  { %1754 = vmatprep.subr.bf16.mxu0 %v1753_v15 }
  0x3a   :  { %1756 = vmatpush3.bf16.msra.mxu0 %v1753_v15  ;;  %v1785_v15 = vpack.c.bf16 %v385_v14, %v384_v13 }
  0x3b   :  { %1758 = vmatprep.subr.bf16.mxu0 %v1757_v18 }
  0x3e   :  { %1760 = vmatpush3.bf16.msra.mxu0 %v1757_v18 }
  0x3f   :  { %1762 = vmatprep.subr.bf16.mxu0 %v1761_v21 }
  0x42   :  { %1764 = vmatpush3.bf16.msra.mxu0 %v1761_v21 }
  0x43   :  { %1766 = vmatprep.subr.bf16.mxu0 %v1765_v24 }
  0x46   :  { %1768 = vmatpush3.bf16.msra.mxu0 %v1765_v24 }
  0x49   :  { %1474 = vmatmul.mubr.f32.vlgmr.msra.gmra.mrb[0].mxu0 %v63_v25 }
  0x4a   :  { %1476 = vmatprep.mubr.f32.mxu0 %v64_v26 }
  0x4d   :  { %1477 = vmatmul.mubr.f32.gmra.mrb[2].mxu0 %v65_v27 }
 0x11c   :  { %v1475_v29 = vpop.f32.mrb[0].mxu0 }
 0x11d   :  { %v149_v30 = vpop.f32.mrb[1].mxu0 }
 0x11e   :  { %v1769_v31 = vpack.c.bf16 %v1475_v29, %v149_v30 }
 0x120   :  { %v1478_v32 = vpop.f32.mrb[2].mxu0  ;;  %1770 = vmatprep.subr.bf16.mxu1 %v1769_v31 }
 0x121   :  { %v159_v33 = vpop.f32.mrb[3].mxu0  ;;  %1772 = vmatpush3.bf16.msra.mxu1 %v1769_v31 }
 0x122   :  { %v1773_v34 = vpack.c.bf16 %v1478_v32, %v159_v33 }
 0x124   :  { %1774 = vmatprep.subr.bf16.mxu1 %v1773_v34 }
 0x125   :  { %1776 = vmatpush3.bf16.msra.mxu1 %v1773_v34 }
 0x126   :  { %1778 = vmatprep.subr.bf16.mxu1 %v1777_v10 }
 0x128   :  { %1488 = vmatmul.mubr.msk.f32.vlgmr.msra.gmra.mrb[0].mxu1 %vm174_vm0, %v2164_v35 }
 0x129   :  { %1490 = vmatprep.mubr.msk.f32.mxu1 %vm174_vm0, %v2169_v36  ;;  %1780 = vmatpush3.bf16.msra.mxu1 %v1777_v10 }
 0x12a   :  { %1782 = vmatprep.subr.bf16.mxu1 %v1781_v12 }
 0x12c   :  { %1491 = vmatmul.mubr.msk.f32.gmra.mrb[2].mxu1 %vm174_vm0, %v2178_v37 }
 0x12d   :  { %1784 = vmatpush3.bf16.msra.mxu1 %v1781_v12 }
 0x12e   :  { %1786 = vmatprep.subr.bf16.mxu1 %v1785_v15 }
 0x131   :  { %1788 = vmatpush3.bf16.msra.mxu1 %v1785_v15 }
 0x1fb   :  { %v1489_v39 = vpop.f32.mrb[0].mxu1 }
 0x1fc   :  { %v259_v40 = vadd.f32 %v1489_v39, %v1270_v38  ;;  %v253_v41 = vpop.f32.mrb[1].mxu1 }
 0x1fd   :  { %v254_v42 = vadd.f32 %v1270_v38, %v253_v41 }
 0x1fe   :  { %v273_v43 = vmul.f32 %v259_v40, %v259_v40 }
 0x1ff   :  { %v1492_v44 = vpop.f32.mrb[2].mxu1  ;;  %v272_v45 = vmul.f32 %v254_v42, %v254_v42 }
 0x200   :  { %v269_v46 = vadd.f32 %v1492_v44, %v1270_v38  ;;  %278 = vadd.xlane.f32.xlu1 %v273_v43  ;;  %v263_v47 = vpop.f32.mrb[3].mxu1  ;;  %v387_v43 = vld [vmem:[#allocation2 + $0xb8] sm:$0xff] }
 0x201   :  { %v264_v48 = vadd.f32 %v1270_v38, %v263_v47  ;;  %276 = vadd.xlane.f32.xlu0 %v272_v45  ;;  %v388_v45 = vld [vmem:[#allocation2 + $0xc0] sm:$0xff] }
 0x202   :  { %v275_v49 = vmul.f32 %v269_v46, %v269_v46 }
 0x203   :  { %v274_v50 = vmul.f32 %v264_v48, %v264_v48 }
 0x204   :  { %282 = vadd.xlane.f32.xlu1 %v275_v49  ;;  %v391_v49 = vld [vmem:[#allocation2 + $0xd8] sm:$0xff] }
 0x205   :  { %280 = vadd.xlane.f32.xlu0 %v274_v50 }
 0x28d   :  { %v279_v51 = vpop.xlane.xlu1 %278 }
 0x28e   :  { %v285_v52 = vmax.f32 %v279_v51, 1e-24  ;;  %v277_v53 = vpop.xlane.xlu0 %276  ;;  %v392_v51 = vld [vmem:[#allocation2 + $0xe0] sm:$0xff] }
 0x28f   :  { %v284_v54 = vmax.f32 %v277_v53, 1e-24  ;;  %v394_v53 = vld [vmem:[#allocation2 + $0xf0] sm:$0xff] }
 0x290   :  { %1961 = vrsqrt.f32 %v285_v52  ;;  %v393_v52 = vld [vmem:[#allocation2 + $0xe8] sm:$0xff] }
 0x291   :  { %1963 = vrsqrt.f32 %v284_v54  ;;  %v283_v55 = vpop.xlane.xlu1 %282  ;;  %v1801_v54 = vpack.c.bf16 %v393_v52, %v392_v51  ;;  %v373_v52 = vld [vmem:[#allocation5 + $0x50] sm:$0xff] }
 0x292   :  { %v287_v56 = vmax.f32 %v283_v55, 1e-24  ;;  %v281_v57 = vpop.xlane.xlu0 %280  ;;  %v395_v55 = vld [vmem:[#allocation2 + $0xf8] sm:$0xff] }
 0x293   :  { %v286_v58 = vmax.f32 %v281_v57, 1e-24 }
 0x294   :  { %1965 = vrsqrt.f32 %v287_v56  ;;  %v1805_v56 = vpack.c.bf16 %v395_v55, %v394_v53  ;;  %v374_v53 = vld [vmem:[#allocation5 + $0x58] sm:$0xff]  ;;  %v375_v55 = vld [vmem:[#allocation5 + $0x60] sm:$0xff] }
 0x295   :  { %1967 = vrsqrt.f32 %v286_v58 }
 0x29a   :  { %v1962_v59 = vpop.eup %1961 }
 0x29b   :  { %v1964_v60 = vpop.eup %1963  ;;  %v293_v0 = vmul.f32 %v1962_v59, %v259_v40 }
 0x29c   :  { %v292_v61 = vmul.f32 %v1964_v60, %v254_v42  ;;  %v386_v42 = vld [vmem:[#allocation2 + $0xb0] sm:$0xff] }
 0x29d   :  { %v297_v3 = vmax.f32 %v293_v0, 0.0  ;;  %v1789_v44 = vpack.c.bf16 %v387_v43, %v386_v42  ;;  %v367_v43 = vld [vmem:[#allocation5 + $0x20] sm:$0xff] }
 0x29e   :  { %v1966_v62 = vpop.eup %1965  ;;  %v296_v63 = vmax.f32 %v292_v61, 0.0 }
 0x29f   :  { %v1968_v1 = vpop.eup %1967  ;;  %v295_v5 = vmul.f32 %v1966_v62, %v269_v46  ;;  %1790 = vmatprep.subr.bf16.mxu1 %v1789_v44  ;;  %v389_v46 = vld [vmem:[#allocation2 + $0xc8] sm:$0xff] }
 0x2a0   :  { %300 = vadd.xlane.f32.xlu0 %v296_v63  ;;  %v294_v2 = vmul.f32 %v1968_v1, %v264_v48  ;;  %1792 = vmatpush3.bf16.msra.mxu1 %v1789_v44  ;;  %v1793_v47 = vpack.c.bf16 %v389_v46, %v388_v45  ;;  %v390_v48 = vld [vmem:[#allocation2 + $0xd0] sm:$0xff]  ;;  %v368_v44 = vld [vmem:[#allocation5 + $0x28] sm:$0xff] }
 0x2a1   :  { %v299_v6 = vmax.f32 %v295_v5, 0.0  ;;  %v1797_v50 = vpack.c.bf16 %v391_v49, %v390_v48  ;;  %v1848_v45 = vpack.c.bf16 %v368_v44, %v367_v43  ;;  %v369_v46 = vld [vmem:[#allocation5 + $0x30] sm:$0xff]  ;;  %v371_v49 = vld [vmem:[#allocation5 + $0x40] sm:$0xff] }
 0x2a2   :  { %v298_v4 = vmax.f32 %v294_v2, 0.0  ;;  %1794 = vmatprep.subr.bf16.mxu1 %v1793_v47 }
 0x2a4   :  { %302 = vadd.xlane.f32.xlu0 %v297_v3  ;;  %304 = vadd.xlane.f32.xlu1 %v298_v4 }
 0x2a5   :  { %1796 = vmatpush3.bf16.msra.mxu1 %v1793_v47  ;;  %v370_v47 = vld [vmem:[#allocation5 + $0x38] sm:$0xff] }
 0x2a6   :  { %1798 = vmatprep.subr.bf16.mxu1 %v1797_v50  ;;  %v1851_v48 = vpack.c.bf16 %v370_v47, %v369_v46 }
 0x2a8   :  { %306 = vadd.xlane.f32.xlu1 %v299_v6 }
 0x2a9   :  { %1800 = vmatpush3.bf16.msra.mxu1 %v1797_v50  ;;  %v372_v50 = vld [vmem:[#allocation5 + $0x48] sm:$0xff] }
 0x2aa   :  { %1802 = vmatprep.subr.bf16.mxu1 %v1801_v54  ;;  %v1854_v51 = vpack.c.bf16 %v372_v50, %v371_v49 }
 0x2ad   :  { %1804 = vmatpush3.bf16.msra.mxu1 %v1801_v54  ;;  %v1857_v54 = vpack.c.bf16 %v374_v53, %v373_v52 }
 0x2ae   :  { %1806 = vmatprep.subr.bf16.mxu1 %v1805_v56 }
 0x2b1   :  { %1808 = vmatpush3.bf16.msra.mxu1 %v1805_v56  ;;  %v376_v56 = vld [vmem:[#allocation5 + $0x68] sm:$0xff] }
 0x32d   :  { %v301_v17 = vpop.xlane.xlu0 %300 }
 0x331   :  { %v305_v18 = vpop.xlane.xlu1 %304  ;;  %v303_v22 = vpop.xlane.xlu0 %302 }
 0x332   :  { %v308_v20 = vadd.f32 %v305_v18, %v301_v17 }
 0x334   :  { %v310_v21 = vmul.f32 0.015625, %v308_v20 }
 0x335   :  { %v307_v23 = vpop.xlane.xlu1 %306 }
 0x336   :  { %v315_v24 = vsub.f32 %v296_v63, %v310_v21  ;;  %v317_v25 = vsub.f32 %v298_v4, %v310_v21  ;;  %v309_v26 = vadd.f32 %v307_v23, %v303_v22 }
 0x338   :  { %v311_v27 = vmul.f32 0.015625, %v309_v26  ;;  %v323_v29 = vsel %vm314_vm1, %v317_v25, 0.0  ;;  %v321_v30 = vsel %vm314_vm1, %v315_v24, 0.0  ;;  %v2071_v26 = vmov 0.0  }
 0x339   :  { %v327_v31 = vmul.f32 %v323_v29, %v323_v29  ;;  %v325_v32 = vmul.f32 %v321_v30, %v321_v30  ;;  %1577 = vmatprep.mubr.msk.f32.mxu0 %vm2070_vm3, %v2071_v26 }
 0x33a   :  { %v316_v33 = vsub.f32 %v297_v3, %v311_v27  ;;  %v318_v34 = vsub.f32 %v299_v6, %v311_v27 }
 0x33b   :  { %333 = vadd.xlane.f32.xlu1 %v327_v31  ;;  %329 = vadd.xlane.f32.xlu0 %v325_v32 }
 0x33c   :  { %v324_v38 = vsel %vm314_vm1, %v318_v34, 0.0  ;;  %v322_v39 = vsel %vm314_vm1, %v316_v33, 0.0 }
 0x33d   :  { %v328_v40 = vmul.f32 %v324_v38, %v324_v38  ;;  %v326_v41 = vmul.f32 %v322_v39, %v322_v39  ;;  %v364_v38 = vld [vmem:[#allocation5 + $0x8] sm:$0xff] }
 0x33f   :  { %335 = vadd.xlane.f32.xlu1 %v328_v40  ;;  %331 = vadd.xlane.f32.xlu0 %v326_v41  ;;  %v365_v40 = vld [vmem:[#allocation5 + $0x10] sm:$0xff]  ;;  %v366_v41 = vld [vmem:[#allocation5 + $0x18] sm:$0xff] }
 0x340   :  { %v1845_v42 = vpack.c.bf16 %v366_v41, %v365_v40 }
 0x3c8   :  { %v334_v57 = vpop.xlane.xlu1 %333  ;;  %v330_v58 = vpop.xlane.xlu0 %329 }
 0x3c9   :  { %v337_v59 = vadd.f32 %v334_v57, %v330_v58  ;;  %v1860_v57 = vpack.c.bf16 %v376_v56, %v375_v55  ;;  %v377_v58 = vld [vmem:[#allocation5 + $0x70] sm:$0xff] }
 0x3cb   :  { %v339_v60 = vmul.f32 0.015625, %v337_v59  ;;  %v378_v59 = vld [vmem:[#allocation5 + $0x78] sm:$0xff] }
 0x3cc   :  { %v336_v61 = vpop.xlane.xlu1 %335  ;;  %v332_v62 = vpop.xlane.xlu0 %331 }
 0x3cd   :  { %v341_v63 = vadd.f32 1e-05, %v339_v60  ;;  %v338_v0 = vadd.f32 %v336_v61, %v332_v62  ;;  %v1863_v60 = vpack.c.bf16 %v378_v59, %v377_v58  ;;  %v1276_v61 = vld [vmem:[%s2380_s3 + $0x1] ss:$0 sm:$0xff]  ;;  %v662_v59 = vld [vmem:[#allocation5 + $0x88] sm:$0xff] }
 0x3ce   :  { %v661_v58 = vld [vmem:[#allocation5 + $0x80] sm:$0xff] }
 0x3cf   :  { %1969 = vrsqrt.f32 %v341_v63  ;;  %v340_v1 = vmul.f32 0.015625, %v338_v0 }
 0x3d1   :  { %v342_v2 = vadd.f32 1e-05, %v340_v1 }
 0x3d3   :  { %1971 = vrsqrt.f32 %v342_v2 }
 0x3d9   :  { %v1970_v3 = vpop.eup %1969 }
 0x3da   :  { %v345_v4 = vmul.f32 %v1970_v3, %v315_v24  ;;  %v347_v7 = vmul.f32 %v1970_v3, %v317_v25  ;;  %v2069_v25 = vmov 0.0|0.0  }
 0x3db   :  { %1817 = vmatprep.subr.bf16.mxu0 %v2069_v25 }
 0x3dc   :  { %1525 = vmatprep.mubr.f32.mxu1 %v345_v4 }
 0x3dd   :  { %v1972_v5 = vpop.eup %1971 }
 0x3de   :  { %v346_v6 = vmul.f32 %v1972_v5, %v316_v33  ;;  %v348_v8 = vmul.f32 %v1972_v5, %v318_v34  ;;  %v363_v34 = vld [vmem:[#allocation5] sm:$0xff] }
 0x3df   :  { %v1842_v39 = vpack.c.bf16 %v364_v38, %v363_v34 }
 0x3e0   :  { %v349_v9 = vmax.f32 %v345_v4, %v346_v6  ;;  %1526 = vmatmul.mubr.f32.vlgmr.msra.gmra.mrb[4].mxu1 %v346_v6  ;;  %v356_v10 = vmax.f32 %v347_v7, %v348_v8 }
 0x3e1   :  { %1528 = vmatprep.mubr.f32.mxu1 %v347_v7 }
 0x3e2   :  { %v350_v11 = vrot.slane %v349_v9, 4  ;;  %v357_v12 = vrot.slane %v356_v10, 4 }
 0x3e4   :  { %v351_v13 = vmax.f32 %v349_v9, %v350_v11  ;;  %v358_v14 = vmax.f32 %v356_v10, %v357_v12  ;;  %1529 = vmatmul.mubr.f32.gmra.mrb[6].mxu1 %v348_v8 }
 0x3e5   :  { %1539 = vmatprep.mubr.msk.f32.mxu1 %vm174_vm0, %v2157_v28 }
 0x3e6   :  { %v352_v15 = vrot.slane %v351_v13, 2  ;;  %v359_v16 = vrot.slane %v358_v14, 2 }
 0x3e8   :  { %v353_v17 = vmax.f32 %v351_v13, %v352_v15  ;;  %v360_v18 = vmax.f32 %v358_v14, %v359_v16 }
 0x3ea   :  { %v354_v20 = vrot.slane %v353_v17, 1  ;;  %v361_v21 = vrot.slane %v360_v18, 1 }
 0x3ec   :  { %v355_v22 = vmax.f32 %v353_v17, %v354_v20  ;;  %v362_v23 = vmax.f32 %v360_v18, %v361_v21 }
 0x3ee   :  { %v754_v24 = vsel %vm679_vm2, %v362_v23, %v355_v22 }
 0x4b3   :  { %v1527_v27 = vpop.f32.mrb[4].mxu1 }
 0x4b4   :  { %v464_v29 = vpop.f32.mrb[5].mxu1 }
 0x4b5   :  { %v1809_v30 = vpack.c.bf16 %v1527_v27, %v464_v29 }
 0x4b7   :  { %v1530_v31 = vpop.f32.mrb[6].mxu1  ;;  %1810 = vmatprep.subr.bf16.mxu1 %v1809_v30 }
 0x4b8   :  { %v474_v32 = vpop.f32.mrb[7].mxu1  ;;  %1812 = vmatpush3.bf16.msra.mxu1 %v1809_v30 }
 0x4b9   :  { %v1813_v33 = vpack.c.bf16 %v1530_v31, %v474_v32 }
 0x4bb   :  { %1814 = vmatprep.subr.bf16.mxu1 %v1813_v33 }
 0x4bc   :  { %1816 = vmatpush3.bf16.msra.mxu1 %v1813_v33 }
 0x4bd   :  { %1841 = vmatprep.subr.bf16.mxu1 %v2069_v25 }
 0x4bf   :  { %1540 = vmatmul.mubr.msk.f32.vlgmr.msra.gmra.mrb[8].mxu1 %vm174_vm0, %v2164_v35 }
 0x4c0   :  { %1843 = vmatpush3.bf16.msra.mxu1 %v1842_v39  ;;  %1542 = vmatprep.mubr.msk.f32.mxu1 %vm174_vm0, %v2169_v36 }
 0x4c1   :  { %1844 = vmatprep.subr.bf16.mxu1 %v2069_v25 }
 0x4c3   :  { %1543 = vmatmul.mubr.msk.f32.gmra.mrb[10].mxu1 %vm174_vm0, %v2178_v37 }
 0x4c4   :  { %1846 = vmatpush3.bf16.msra.mxu1 %v1845_v42  ;;  %1612 = vmatprep.mubr.msk.f32.mxu1 %vm2070_vm3, %v2071_v26 }
 0x4c5   :  { %1847 = vmatprep.subr.bf16.mxu1 %v2069_v25 }
 0x4c8   :  { %1849 = vmatpush3.bf16.msra.mxu1 %v1848_v45 }
 0x4c9   :  { %1850 = vmatprep.subr.bf16.mxu1 %v2069_v25 }
 0x4cc   :  { %1852 = vmatpush3.bf16.msra.mxu1 %v1851_v48 }
 0x4cd   :  { %1853 = vmatprep.subr.bf16.mxu1 %v2069_v25 }
 0x4d0   :  { %1855 = vmatpush3.bf16.msra.mxu1 %v1854_v51 }
 0x4d1   :  { %1856 = vmatprep.subr.bf16.mxu1 %v2069_v25 }
 0x4d4   :  { %1858 = vmatpush3.bf16.msra.mxu1 %v1857_v54 }
 0x4d5   :  { %1859 = vmatprep.subr.bf16.mxu1 %v2069_v25 }
 0x4d8   :  { %1861 = vmatpush3.bf16.msra.mxu1 %v1860_v57 }
 0x4d9   :  { %1862 = vmatprep.subr.bf16.mxu1 %v2069_v25 }
 0x4dc   :  { %1864 = vmatpush3.bf16.msra.mxu1 %v1863_v60  ;;  %v1818_v60 = vpack.c.bf16 %v662_v59, %v661_v58  ;;  %v829_v59 = vld [vmem:[#allocation2 + $0x110] sm:$0xff] }
 0x4de   :  { %1819 = vmatpush3.bf16.msra.mxu0 %v1818_v60 }
 0x4df   :  { %1613 = vmatmul.mubr.f32.vlgmr.msra.gmra.mrb[12].mxu1 %v754_v24  ;;  %1820 = vmatprep.subr.bf16.mxu0 %v2069_v25 }
 0x4e0   :  { %1661 = vmatprep.mubr.msk.f32.mxu1 %vm174_vm0, %v2157_v28 }
 0x592   :  { %v1541_v62 = vpop.f32.mrb[8].mxu1 }
 0x593   :  { %v561_v63 = vadd.f32 %v1541_v62, %v1276_v61  ;;  %v555_v0 = vpop.f32.mrb[9].mxu1  ;;  %v664_v62 = vld [vmem:[#allocation5 + $0x98] sm:$0xff] }
 0x594   :  { %v556_v1 = vadd.f32 %v1276_v61, %v555_v0  ;;  %v665_v0 = vld [vmem:[#allocation5 + $0xa0] sm:$0xff] }
 0x595   :  { %v575_v2 = vmul.f32 %v561_v63, %v561_v63 }
 0x596   :  { %v1544_v3 = vpop.f32.mrb[10].mxu1  ;;  %v574_v4 = vmul.f32 %v556_v1, %v556_v1 }
 0x597   :  { %v571_v5 = vadd.f32 %v1544_v3, %v1276_v61  ;;  %580 = vadd.xlane.f32.xlu1 %v575_v2  ;;  %v565_v6 = vpop.f32.mrb[11].mxu1  ;;  %v667_v2 = vld [vmem:[#allocation5 + $0xb0] sm:$0xff]  ;;  %v668_v3 = vld [vmem:[#allocation5 + $0xb8] sm:$0xff] }
 0x598   :  { %v566_v7 = vadd.f32 %v1276_v61, %v565_v6  ;;  %578 = vadd.xlane.f32.xlu0 %v574_v4  ;;  %v663_v61 = vld [vmem:[#allocation5 + $0x90] sm:$0xff]  ;;  %v1827_v4 = vpack.c.bf16 %v668_v3, %v667_v2  ;;  %v670_v6 = vld [vmem:[#allocation5 + $0xc8] sm:$0xff]  ;;  %v835_v2 = vld [vmem:[#allocation2 + $0x140] sm:$0xff] }
 0x599   :  { %v577_v8 = vmul.f32 %v571_v5, %v571_v5  ;;  %v836_v3 = vld [vmem:[#allocation2 + $0x148] sm:$0xff] }
 0x59a   :  { %v576_v9 = vmul.f32 %v566_v7, %v566_v7 }
 0x59b   :  { %584 = vadd.xlane.f32.xlu1 %v577_v8  ;;  %v671_v8 = vld [vmem:[#allocation5 + $0xd0] sm:$0xff] }
 0x59c   :  { %582 = vadd.xlane.f32.xlu0 %v576_v9  ;;  %v672_v9 = vld [vmem:[#allocation5 + $0xd8] sm:$0xff] }
 0x5b2   :  { %v2223_v28 = vpop.f32.mrb[12].mxu1 }
 0x5b3   :  { %v1614_v10 = vpop.f32.mrb[13].mxu1 }
 0x5b4   :  { %v673_v10 = vld [vmem:[#allocation5 + $0xe0] sm:$0xff] }
 0x624   :  { %v581_v11 = vpop.xlane.xlu1 %580 }
 0x625   :  { %v587_v12 = vmax.f32 %v581_v11, 1e-24  ;;  %v579_v13 = vpop.xlane.xlu0 %578  ;;  %v1833_v11 = vpack.c.bf16 %v672_v9, %v671_v8  ;;  %v839_v8 = vld [vmem:[#allocation2 + $0x160] sm:$0xff]  ;;  %v840_v9 = vld [vmem:[#allocation2 + $0x168] sm:$0xff] }
 0x626   :  { %v586_v14 = vmax.f32 %v579_v13, 1e-24 }
 0x627   :  { %1973 = vrsqrt.f32 %v587_v12  ;;  %v674_v12 = vld [vmem:[#allocation5 + $0xe8] sm:$0xff] }
 0x628   :  { %1975 = vrsqrt.f32 %v586_v14  ;;  %v585_v15 = vpop.xlane.xlu1 %584  ;;  %v1836_v13 = vpack.c.bf16 %v674_v12, %v673_v10  ;;  %v675_v14 = vld [vmem:[#allocation5 + $0xf0] sm:$0xff]  ;;  %v1889_v10 = vpack.c.bf16 %v840_v9, %v839_v8  ;;  %v842_v12 = vld [vmem:[#allocation2 + $0x178] sm:$0xff]  ;;  %v1168_v9 = vld [vmem:[%s2383_s6 + $0x40] sm:$0xff] }
 0x629   :  { %v589_v16 = vmax.f32 %v585_v15, 1e-24  ;;  %v583_v17 = vpop.xlane.xlu0 %582  ;;  %v676_v15 = vld [vmem:[#allocation5 + $0xf8] sm:$0xff] }
 0x62a   :  { %v588_v18 = vmax.f32 %v583_v17, 1e-24  ;;  %v828_v17 = vld [vmem:[#allocation2 + $0x108] sm:$0xff] }
 0x62b   :  { %1977 = vrsqrt.f32 %v589_v16  ;;  %v827_v16 = vld [vmem:[#allocation2 + $0x100] sm:$0xff] }
 0x62c   :  { %1979 = vrsqrt.f32 %v588_v18  ;;  %v1839_v18 = vpack.c.bf16 %v676_v15, %v675_v14 }
 0x631   :  { %v1974_v20 = vpop.eup %1973 }
 0x632   :  { %v1976_v21 = vpop.eup %1975  ;;  %v595_v22 = vmul.f32 %v1974_v20, %v561_v63  ;;  %v1821_v63 = vpack.c.bf16 %v664_v62, %v663_v61  ;;  %v1865_v20 = vpack.c.bf16 %v828_v17, %v827_v16  ;;  %v832_v62 = vld [vmem:[#allocation2 + $0x128] sm:$0xff] }
 0x633   :  { %v594_v23 = vmul.f32 %v1976_v21, %v556_v1  ;;  %v1824_v1 = vpack.c.bf16 %v666_v19, %v665_v0  ;;  %v833_v0 = vld [vmem:[#allocation2 + $0x130] sm:$0xff]  ;;  %v834_v19 = vld [vmem:[#allocation2 + $0x138] sm:$0xff] }
 0x634   :  { %v599_v24 = vmax.f32 %v595_v22, 0.0  ;;  %1822 = vmatpush3.bf16.msra.mxu0 %v1821_v63 }
 0x635   :  { %v1978_v27 = vpop.eup %1977  ;;  %v598_v29 = vmax.f32 %v594_v23, 0.0  ;;  %1823 = vmatprep.subr.bf16.mxu0 %v2069_v25 }
 0x636   :  { %v1980_v30 = vpop.eup %1979  ;;  %604 = vadd.xlane.f32.xlu1 %v599_v24  ;;  %v597_v31 = vmul.f32 %v1978_v27, %v571_v5  ;;  %v669_v5 = vld [vmem:[#allocation5 + $0xc0] sm:$0xff] }
 0x637   :  { %602 = vadd.xlane.f32.xlu0 %v598_v29  ;;  %v596_v32 = vmul.f32 %v1980_v30, %v566_v7  ;;  %v1830_v7 = vpack.c.bf16 %v670_v6, %v669_v5  ;;  %v837_v5 = vld [vmem:[#allocation2 + $0x150] sm:$0xff]  ;;  %v838_v6 = vld [vmem:[#allocation2 + $0x158] sm:$0xff] }
 0x638   :  { %v601_v33 = vmax.f32 %v597_v31, 0.0  ;;  %1825 = vmatpush3.bf16.msra.mxu0 %v1824_v1  ;;  %v1877_v1 = vpack.c.bf16 %v834_v19, %v833_v0  ;;  %v1162_v0 = vld [vmem:[%s2383_s6 + $0x10] sm:$0xff] }
 0x639   :  { %v600_v34 = vmax.f32 %v596_v32, 0.0  ;;  %1826 = vmatprep.subr.bf16.mxu0 %v2069_v25 }
 0x63a   :  { %608 = vadd.xlane.f32.xlu1 %v601_v33 }
 0x63b   :  { %606 = vadd.xlane.f32.xlu0 %v600_v34 }
 0x63c   :  { %1828 = vmatpush3.bf16.msra.mxu0 %v1827_v4  ;;  %v1881_v4 = vpack.c.bf16 %v836_v3, %v835_v2  ;;  %v1164_v3 = vld [vmem:[%s2383_s6 + $0x20] sm:$0xff] }
 0x63d   :  { %1829 = vmatprep.subr.bf16.mxu0 %v2069_v25 }
 0x640   :  { %1831 = vmatpush3.bf16.msra.mxu0 %v1830_v7  ;;  %v1885_v7 = vpack.c.bf16 %v838_v6, %v837_v5  ;;  %v1166_v6 = vld [vmem:[%s2383_s6 + $0x30] sm:$0xff] }
 0x641   :  { %1832 = vmatprep.subr.bf16.mxu0 %v2069_v25 }
 0x644   :  { %1834 = vmatpush3.bf16.msra.mxu0 %v1833_v11  ;;  %v841_v11 = vld [vmem:[#allocation2 + $0x170] sm:$0xff] }
 0x645   :  { %1835 = vmatprep.subr.bf16.mxu0 %v2069_v25 }
 0x648   :  { %1837 = vmatpush3.bf16.msra.mxu0 %v1836_v13  ;;  %v1893_v13 = vpack.c.bf16 %v842_v12, %v841_v11  ;;  %v1170_v12 = vld [vmem:[%s2383_s6 + $0x50] sm:$0xff] }
 0x649   :  { %1838 = vmatprep.subr.bf16.mxu0 %v2069_v25 }
 0x64c   :  { %1840 = vmatpush3.bf16.msra.mxu0 %v1839_v18 }
 0x64d   :  { %1866 = vmatprep.subr.bf16.mxu0 %v1865_v20 }
 0x6c3   :  { %v605_v38 = vpop.xlane.xlu1 %604 }
 0x6c4   :  { %v603_v39 = vpop.xlane.xlu0 %602 }
 0x6c7   :  { %v609_v40 = vpop.xlane.xlu1 %608 }
 0x6c8   :  { %v611_v41 = vadd.f32 %v609_v40, %v605_v38  ;;  %v607_v42 = vpop.xlane.xlu0 %606 }
 0x6c9   :  { %v610_v43 = vadd.f32 %v607_v42, %v603_v39 }
 0x6ca   :  { %v613_v44 = vmul.f32 0.015625, %v611_v41 }
 0x6cb   :  { %v612_v45 = vmul.f32 0.015625, %v610_v43 }
 0x6cc   :  { %v2225_v46 = vsub.f32 %v599_v24, %v613_v44  ;;  %v2227_v47 = vsub.f32 %v601_v33, %v613_v44 }
 0x6cd   :  { %v2229_v48 = vsub.f32 %v598_v29, %v612_v45  ;;  %v2231_v49 = vsub.f32 %v600_v34, %v612_v45 }
 0x6ce   :  { %v619_v50 = vsel %vm314_vm1, %v2225_v46, 0.0  ;;  %v621_v54 = vsel %vm314_vm1, %v2227_v47, 0.0 }
 0x6cf   :  { %v623_v51 = vmul.f32 %v619_v50, %v619_v50  ;;  %v618_v52 = vsel %vm314_vm1, %v2229_v48, 0.0  ;;  %v620_v55 = vsel %vm314_vm1, %v2231_v49, 0.0  ;;  %v625_v56 = vmul.f32 %v621_v54, %v621_v54 }
 0x6d0   :  { %v622_v53 = vmul.f32 %v618_v52, %v618_v52  ;;  %v624_v57 = vmul.f32 %v620_v55, %v620_v55 }
 0x6d1   :  { %628 = vadd.xlane.f32.xlu1 %v623_v51 }
 0x6d2   :  { %626 = vadd.xlane.f32.xlu0 %v622_v53 }
 0x6d5   :  { %632 = vadd.xlane.f32.xlu1 %v625_v56 }
 0x6d6   :  { %630 = vadd.xlane.f32.xlu0 %v624_v57 }
 0x75e   :  { %v629_v21 = vpop.xlane.xlu1 %628 }
 0x75f   :  { %v627_v22 = vpop.xlane.xlu0 %626 }
 0x762   :  { %v633_v23 = vpop.xlane.xlu1 %632 }
 0x763   :  { %v635_v24 = vadd.f32 %v633_v23, %v629_v21  ;;  %v631_v27 = vpop.xlane.xlu0 %630 }
 0x764   :  { %v634_v29 = vadd.f32 %v631_v27, %v627_v22 }
 0x765   :  { %v637_v30 = vmul.f32 0.015625, %v635_v24 }
 0x766   :  { %v636_v31 = vmul.f32 0.015625, %v634_v29 }
 0x767   :  { %v639_v32 = vadd.f32 1e-05, %v637_v30 }
 0x768   :  { %v638_v33 = vadd.f32 1e-05, %v636_v31 }
 0x769   :  { %1981 = vrsqrt.f32 %v639_v32 }
 0x76a   :  { %1983 = vrsqrt.f32 %v638_v33 }
 0x773   :  { %v1982_v34 = vpop.eup %1981 }
 0x774   :  { %v1984_v38 = vpop.eup %1983  ;;  %v643_v39 = vmul.f32 %v1982_v34, %v2225_v46  ;;  %v645_v40 = vmul.f32 %v1982_v34, %v2227_v47  ;;  %v830_v46 = vld [vmem:[#allocation2 + $0x118] sm:$0xff] }
 0x775   :  { %v642_v41 = vmul.f32 %v1984_v38, %v2229_v48  ;;  %v644_v42 = vmul.f32 %v1984_v38, %v2231_v49  ;;  %v1869_v61 = vpack.c.bf16 %v830_v46, %v829_v59  ;;  %v831_v49 = vld [vmem:[#allocation2 + $0x120] sm:$0xff] }
 0x776   :  { %v1873_v63 = vpack.c.bf16 %v832_v62, %v831_v49  ;;  %v1060_v38 = vld [vmem:[#allocation5 + $0x100] sm:$0xff] }
 0x777   :  { %v646_v43 = vmax.f32 %v642_v41, %v643_v39  ;;  %v653_v44 = vmax.f32 %v644_v42, %v645_v40  ;;  %v1072_v46 = vld [vmem:[#allocation5 + $0x160] sm:$0xff] }
 0x778   :  { %v1160_v62 = vld [vmem:[%s2383_s6] sm:$0xff] }
 0x779   :  { %v647_v45 = vrot.slane %v646_v43, 4  ;;  %v654_v50 = vrot.slane %v653_v44, 4 }
 0x77b   :  { %v648_v51 = vmax.f32 %v646_v43, %v647_v45  ;;  %v655_v52 = vmax.f32 %v653_v44, %v654_v50  ;;  %v1064_v44 = vld [vmem:[#allocation5 + $0x120] sm:$0xff]  ;;  %v1065_v45 = vld [vmem:[#allocation5 + $0x128] sm:$0xff] }
 0x77c   :  { %v1912_v50 = vpack.c.bf16 %v1065_v45, %v1064_v44 }
 0x77d   :  { %v649_v53 = vrot.slane %v648_v51, 2  ;;  %v656_v54 = vrot.slane %v655_v52, 2 }
 0x77f   :  { %v650_v55 = vmax.f32 %v648_v51, %v649_v53  ;;  %v657_v56 = vmax.f32 %v655_v52, %v656_v54  ;;  %v1066_v51 = vld [vmem:[#allocation5 + $0x130] sm:$0xff]  ;;  %v1067_v52 = vld [vmem:[#allocation5 + $0x138] sm:$0xff]  ;;  %v1068_v54 = vld [vmem:[#allocation5 + $0x140] sm:$0xff] }
 0x780   :  { %v1915_v53 = vpack.c.bf16 %v1067_v52, %v1066_v51 }
 0x781   :  { %v651_v57 = vrot.slane %v650_v55, 1  ;;  %v658_v58 = vrot.slane %v657_v56, 1 }
 0x783   :  { %v652_v60 = vmax.f32 %v650_v55, %v651_v57  ;;  %v659_v47 = vmax.f32 %v657_v56, %v658_v58  ;;  %v1069_v55 = vld [vmem:[#allocation5 + $0x148] sm:$0xff]  ;;  %v1070_v57 = vld [vmem:[#allocation5 + $0x150] sm:$0xff]  ;;  %v1071_v58 = vld [vmem:[#allocation5 + $0x158] sm:$0xff] }
 0x784   :  { %v1918_v56 = vpack.c.bf16 %v1069_v55, %v1068_v54  ;;  %v1921_v59 = vpack.c.bf16 %v1071_v58, %v1070_v57  ;;  %v1175_v57 = vld [vmem:[%s2383_s6 + $0x78] sm:$0xff] }
 0x785   :  { %v680_v48 = vsel %vm679_vm2, %v659_v47, %v652_v60  ;;  %v1073_v60 = vld [vmem:[#allocation5 + $0x168] sm:$0xff] }
 0x786   :  { %1578 = vmatmul.mubr.f32.vlgmr.msra.gmra.mrb[4].mxu0 %v680_v48  ;;  %v1924_v47 = vpack.c.bf16 %v1073_v60, %v1072_v46  ;;  %v1075_v48 = vld [vmem:[#allocation5 + $0x178] sm:$0xff]  ;;  %v1287_v46 = vld [vmem:[%s2382_s5] ss:$0 sm:$0xff] }
 0x787   :  { %1868 = vmatpush3.bf16.msra.mxu0 %v1865_v20  ;;  %1647 = vmatprep.mubr.f32.mxu0 %v642_v41  ;;  %v1062_v41 = vld [vmem:[#allocation5 + $0x110] sm:$0xff] }
 0x788   :  { %1870 = vmatprep.subr.bf16.mxu0 %v1869_v61 }
 0x78b   :  { %1872 = vmatpush3.bf16.msra.mxu0 %v1869_v61  ;;  %v1074_v61 = vld [vmem:[#allocation5 + $0x170] sm:$0xff] }
 0x78c   :  { %1874 = vmatprep.subr.bf16.mxu0 %v1873_v63  ;;  %v1927_v49 = vpack.c.bf16 %v1075_v48, %v1074_v61  ;;  %v1288_v48 = vld [vmem:[%s2384_s7] ss:$0 sm:$0xff] }
 0x78f   :  { %1876 = vmatpush3.bf16.msra.mxu0 %v1873_v63  ;;  %v1161_v63 = vld [vmem:[%s2383_s6 + $0x8] sm:$0xff] }
 0x790   :  { %1878 = vmatprep.subr.bf16.mxu0 %v1877_v1  ;;  %v1930_v19 = vpack.c.bf16 %v1161_v63, %v1160_v62 }
 0x793   :  { %1880 = vmatpush3.bf16.msra.mxu0 %v1877_v1  ;;  %v1163_v1 = vld [vmem:[%s2383_s6 + $0x18] sm:$0xff] }
 0x794   :  { %1882 = vmatprep.subr.bf16.mxu0 %v1881_v4  ;;  %v1933_v2 = vpack.c.bf16 %v1163_v1, %v1162_v0 }
 0x797   :  { %1884 = vmatpush3.bf16.msra.mxu0 %v1881_v4  ;;  %v1165_v4 = vld [vmem:[%s2383_s6 + $0x28] sm:$0xff] }
 0x798   :  { %1886 = vmatprep.subr.bf16.mxu0 %v1885_v7  ;;  %v1936_v5 = vpack.c.bf16 %v1165_v4, %v1164_v3 }
 0x79b   :  { %1888 = vmatpush3.bf16.msra.mxu0 %v1885_v7  ;;  %v1167_v7 = vld [vmem:[%s2383_s6 + $0x38] sm:$0xff] }
 0x79c   :  { %1890 = vmatprep.subr.bf16.mxu0 %v1889_v10  ;;  %v1939_v8 = vpack.c.bf16 %v1167_v7, %v1166_v6 }
 0x79f   :  { %1892 = vmatpush3.bf16.msra.mxu0 %v1889_v10  ;;  %v1169_v10 = vld [vmem:[%s2383_s6 + $0x48] sm:$0xff] }
 0x7a0   :  { %1894 = vmatprep.subr.bf16.mxu0 %v1893_v13  ;;  %v1942_v11 = vpack.c.bf16 %v1169_v10, %v1168_v9 }
 0x7a3   :  { %1896 = vmatpush3.bf16.msra.mxu0 %v1893_v13  ;;  %v1171_v13 = vld [vmem:[%s2383_s6 + $0x58] sm:$0xff] }
 0x7a4   :  { %1929 = vmatprep.subr.bf16.mxu0 %v2069_v25 }
 0x7a6   :  { %1648 = vmatmul.mubr.f32.vlgmr.msra.gmra.mrb[6].mxu0 %v643_v39  ;;  %v1061_v39 = vld [vmem:[#allocation5 + $0x108] sm:$0xff] }
 0x7a7   :  { %1650 = vmatprep.mubr.f32.mxu0 %v644_v42  ;;  %v1063_v42 = vld [vmem:[#allocation5 + $0x118] sm:$0xff]  ;;  %1931 = vmatpush3.bf16.msra.mxu0 %v1930_v19 }
 0x7a8   :  { %v1909_v43 = vpack.c.bf16 %v1063_v42, %v1062_v41  ;;  %1932 = vmatprep.subr.bf16.mxu0 %v2069_v25 }
 0x7aa   :  { %1651 = vmatmul.mubr.f32.gmra.mrb[8].mxu0 %v645_v40  ;;  %v1906_v40 = vpack.c.bf16 %v1061_v39, %v1060_v38 }
 0x7ab   :  { %1734 = vmatprep.mubr.msk.f32.mxu0 %vm2070_vm3, %v2071_v26  ;;  %1934 = vmatpush3.bf16.msra.mxu0 %v1933_v2 }
 0x7ac   :  { %1935 = vmatprep.subr.bf16.mxu0 %v2069_v25 }
 0x7af   :  { %1937 = vmatpush3.bf16.msra.mxu0 %v1936_v5 }
 0x7b0   :  { %1938 = vmatprep.subr.bf16.mxu0 %v2069_v25 }
 0x7b3   :  { %1940 = vmatpush3.bf16.msra.mxu0 %v1939_v8 }
 0x7b4   :  { %1941 = vmatprep.subr.bf16.mxu0 %v2069_v25 }
 0x7b7   :  { %1943 = vmatpush3.bf16.msra.mxu0 %v1942_v11 }
 0x7b8   :  { %1944 = vmatprep.subr.bf16.mxu0 %v2069_v25 }
 0x859   :  { %v748_v14 = vpop.f32.mrb[4].mxu0 }
 0x85a   :  { %v2261_v15 = vadd.f32 %v2223_v28, %v748_v14  ;;  %v1579_v16 = vpop.f32.mrb[5].mxu0  ;;  %v1282_v28 = vld [vmem:[%s2380_s3 + $0x2] ss:$0 sm:$0xff]  ;;  %v1945_v14 = vpack.c.bf16 %v1171_v13, %v1170_v12 }
 0x85c   :  { %1946 = vmatpush3.bf16.msra.mxu0 %v1945_v14 }
 0x85d   :  { %1947 = vmatprep.subr.bf16.mxu0 %v2069_v25 }
 0x879   :  { %v1649_v17 = vpop.f32.mrb[6].mxu0 }
 0x87a   :  { %v911_v18 = vpop.f32.mrb[7].mxu0 }
 0x87b   :  { %v1897_v20 = vpack.c.bf16 %v1649_v17, %v911_v18 }
 0x87d   :  { %v1652_v21 = vpop.f32.mrb[8].mxu0  ;;  %1898 = vmatprep.subr.bf16.mxu1 %v1897_v20 }
 0x87e   :  { %v921_v22 = vpop.f32.mrb[9].mxu0  ;;  %1900 = vmatpush3.bf16.msra.mxu1 %v1897_v20 }
 0x87f   :  { %v1901_v23 = vpack.c.bf16 %v1652_v21, %v921_v22 }
 0x881   :  { %1902 = vmatprep.subr.bf16.mxu1 %v1901_v23 }
 0x882   :  { %1904 = vmatpush3.bf16.msra.mxu1 %v1901_v23 }
 0x883   :  { %1905 = vmatprep.subr.bf16.mxu1 %v2069_v25 }
 0x885   :  { %1662 = vmatmul.mubr.msk.f32.vlgmr.msra.gmra.mrb[14].mxu1 %vm174_vm0, %v2164_v35 }
 0x886   :  { %1664 = vmatprep.mubr.msk.f32.mxu1 %vm174_vm0, %v2169_v36  ;;  %1907 = vmatpush3.bf16.msra.mxu1 %v1906_v40 }
 0x887   :  { %1908 = vmatprep.subr.bf16.mxu1 %v2069_v25 }
 0x889   :  { %1665 = vmatmul.mubr.msk.f32.gmra.mrb[16].mxu1 %vm174_vm0, %v2178_v37 }
 0x88a   :  { %1699 = vmatprep.mubr.msk.f32.mxu1 %vm2070_vm3, %v2071_v26  ;;  %1910 = vmatpush3.bf16.msra.mxu1 %v1909_v43 }
 0x88b   :  { %1911 = vmatprep.subr.bf16.mxu1 %v2069_v25 }
 0x88e   :  { %1913 = vmatpush3.bf16.msra.mxu1 %v1912_v50 }
 0x88f   :  { %1914 = vmatprep.subr.bf16.mxu1 %v2069_v25 }
 0x892   :  { %1916 = vmatpush3.bf16.msra.mxu1 %v1915_v53 }
 0x893   :  { %1917 = vmatprep.subr.bf16.mxu1 %v2069_v25 }
 0x896   :  { %1919 = vmatpush3.bf16.msra.mxu1 %v1918_v56  ;;  %v1174_v56 = vld [vmem:[%s2383_s6 + $0x70] sm:$0xff] }
 0x897   :  { %1920 = vmatprep.subr.bf16.mxu1 %v2069_v25  ;;  %v1951_v58 = vpack.c.bf16 %v1175_v57, %v1174_v56 }
 0x89a   :  { %1922 = vmatpush3.bf16.msra.mxu1 %v1921_v59 }
 0x89b   :  { %1923 = vmatprep.subr.bf16.mxu1 %v2069_v25 }
 0x89e   :  { %1925 = vmatpush3.bf16.msra.mxu1 %v1924_v47 }
 0x89f   :  { %1926 = vmatprep.subr.bf16.mxu1 %v2069_v25 }
 0x8a2   :  { %1928 = vmatpush3.bf16.msra.mxu1 %v1927_v49 }
 0x958   :  { %v1663_v24 = vpop.f32.mrb[14].mxu1 }
 0x959   :  { %v2275_v27 = vadd.f32 %v1663_v24, %v1282_v28  ;;  %v1002_v29 = vpop.f32.mrb[15].mxu1 }
 0x95a   :  { %v2277_v30 = vadd.f32 %v1282_v28, %v1002_v29 }
 0x95b   :  { %v1022_v35 = vmul.f32 %v2275_v27, %v2275_v27 }
 0x95c   :  { %v1666_v36 = vpop.f32.mrb[16].mxu1  ;;  %v1021_v37 = vmul.f32 %v2277_v30, %v2277_v30 }
 0x95d   :  { %v2283_v31 = vadd.f32 %v1666_v36, %v1282_v28  ;;  %1027 = vadd.xlane.f32.xlu1 %v1022_v35  ;;  %v1012_v26 = vpop.f32.mrb[17].mxu1 }
 0x95e   :  { %v2285_v32 = vadd.f32 %v1282_v28, %v1012_v26  ;;  %1025 = vadd.xlane.f32.xlu0 %v1021_v37 }
 0x95f   :  { %v1024_v33 = vmul.f32 %v2283_v31, %v2283_v31 }
 0x960   :  { %v1023_v34 = vmul.f32 %v2285_v32, %v2285_v32 }
 0x961   :  { %1031 = vadd.xlane.f32.xlu1 %v1024_v33 }
 0x962   :  { %1029 = vadd.xlane.f32.xlu0 %v1023_v34 }
 0x9ea   :  { %v1028_v16 = vpop.xlane.xlu1 %1027 }
 0x9eb   :  { %v1034_v17 = vmax.f32 %v1028_v16, 1e-24  ;;  %v1026_v18 = vpop.xlane.xlu0 %1025 }
 0x9ec   :  { %v1033_v20 = vmax.f32 %v1026_v18, 1e-24 }
 0x9ed   :  { %1985 = vrsqrt.f32 %v1034_v17 }
 0x9ee   :  { %1987 = vrsqrt.f32 %v1033_v20  ;;  %v1032_v21 = vpop.xlane.xlu1 %1031 }
 0x9ef   :  { %v1036_v22 = vmax.f32 %v1032_v21, 1e-24  ;;  %v1030_v23 = vpop.xlane.xlu0 %1029 }
 0x9f0   :  { %v1035_v28 = vmax.f32 %v1030_v23, 1e-24 }
 0x9f1   :  { %1989 = vrsqrt.f32 %v1036_v22 }
 0x9f2   :  { %1991 = vrsqrt.f32 %v1035_v28 }
 0x9f7   :  { %v1986_v24 = vpop.eup %1985 }
 0x9f8   :  { %v1988_v29 = vpop.eup %1987  ;;  %v1042_v35 = vmul.f32 %v1986_v24, %v2275_v27 }
 0x9f9   :  { %v1041_v36 = vmul.f32 %v1988_v29, %v2277_v30 }
 0x9fb   :  { %v1990_v37 = vpop.eup %1989  ;;  %v1045_v26 = vmax.f32 %v1041_v36, %v1042_v35 }
 0x9fc   :  { %v1992_v33 = vpop.eup %1991  ;;  %v1044_v34 = vmul.f32 %v1990_v37, %v2283_v31  ;;  %v1172_v31 = vld [vmem:[%s2383_s6 + $0x60] sm:$0xff] }
 0x9fd   :  { %v1046_v38 = vrot.slane %v1045_v26, 4  ;;  %v1043_v39 = vmul.f32 %v1992_v33, %v2285_v32  ;;  %v1173_v32 = vld [vmem:[%s2383_s6 + $0x68] sm:$0xff]  ;;  %s2037_s6 = scalar_lea.vmem %s1261_s12, 32 }
 0x9fe   :  { %v1948_v55 = vpack.c.bf16 %v1173_v32, %v1172_v31  ;;  %p2038_p2 = scmp.ne.s32.totalorder %s1261_s12, %s2037_s6  ;;  %p2043_p4 = scmp.lt.s32.totalorder %s2037_s6, %s2037_s6 }
 0x9ff   :  { %v1052_v40 = vmax.f32 %v1043_v39, %v1044_v34  ;;  %v1047_v41 = vmax.f32 %v1045_v26, %v1046_v38 }
 0xa00   :  { %1949 = vmatpush3.bf16.msra.mxu0 %v1948_v55  ;;  %p2044_p5 = por %p2043_p4, %p2042_p3 }
 0xa01   :  { %v1053_v42 = vrot.slane %v1052_v40, 4  ;;  %v1048_v43 = vrot.slane %v1047_v41, 2  ;;  %1950 = vmatprep.subr.bf16.mxu0 %v2069_v25 }
 0xa02   :  { %p2045_p6 = pnand %p2044_p5, %p2038_p2 }
 0xa03   :  { %v1049_v44 = vmax.f32 %v1047_v41, %v1048_v43  ;;  %v1054_v45 = vmax.f32 %v1052_v40, %v1053_v42 }
 0xa04   :  { %1952 = vmatpush3.bf16.msra.mxu0 %v1951_v58 }
 0xa05   :  { %v1055_v50 = vrot.slane %v1054_v45, 2  ;;  %v1050_v51 = vrot.slane %v1049_v44, 1 }
 0xa07   :  { %v1056_v52 = vmax.f32 %v1054_v45, %v1055_v50  ;;  %v1051_v53 = vmax.f32 %v1049_v44, %v1050_v51 }
 0xa09   :  { %v1057_v27 = vrot.slane %v1056_v52, 1 }
 0xa0b   :  { %v1058_v30 = vmax.f32 %v1056_v52, %v1057_v27 }
 0xa0d   :  { %v1078_v54 = vsel %vm679_vm2, %v1058_v30, %v1051_v53 }
 0xa0e   :  { %1700 = vmatmul.mubr.f32.vlgmr.msra.gmra.mrb[18].mxu1 %v1078_v54 }
 0xae1   :  { %v1146_v59 = vpop.f32.mrb[18].mxu1 }
 0xae2   :  { %v1150_v60 = vadd.f32 %v1146_v59, %v2261_v15  ;;  %v1701_v47 = vpop.f32.mrb[19].mxu1 }
 0xae4   :  { %v1158_v61 = vadd.f32 %v1287_v46, %v1150_v60 }
 0xae6   :  { %v1159_v25 = vmax.f32 %v1158_v61, 0.0 }
 0xae8   :  { %1735 = vmatmul.mubr.f32.vlgmr.msra.gmra.mrb[10].mxu0 %v1159_v25 }
 0xbbb   :  { %v1249_v49 = vpop.f32.mrb[10].mxu0 }
 0xbbc   :  { %v1250_v62 = vadd.f32 %v1288_v48, %v1249_v49  ;;  %v1736_v63 = vpop.f32.mrb[11].mxu0 }
 0xbbe   :  { %1253 = vst [vmem:[#allocation7] sm:$0x3] %v1250_v62 }
 0xbbf   :  { %2048 = shalt.err (!%p2045_p6)
}
 0xbc0   :  { %s2049_s14 = scalar_lea.hbm %s2385_s8, 32 }
 0xbc1   :  { %p2050_p7 = scmp.ne.s32.totalorder %s2385_s8, %s2049_s14  ;;  %p2053_p8 = scmp.lt.u32.totalorder %s2049_s14, %s2385_s8 }
 0xbc3   :  { %p2055_p9 = pnand %p2053_p8, %p2050_p7 }
 0xbc5   :  { %2058 = shalt.err (!%p2055_p9)
}
 0xbc6   :  { %1263 = dma.vmem_to_hbm [thread:$0]  %s1261_s12, 32, %s2385_s8, [#allocation4]  }
 0xbc7   :  { %2063 = dma.done.wait [#allocation4], 32  }
 0xbc8   :  { %2064 = vsyncadd [#allocation4], 4294967264 }
 0xbc9   :  { %1267 = vsyncpa [#allocation3], 1 }
 0xbca   :  { %1268 = vsyncpa [#allocation6], 1 }
 0xbcb   :  { %1269 = vsyncpa [#allocation4], 1 }

</bundles_post_ra>
